<compile_context>
chip_gen: v7x
topology: tpu7x:2x2x1
jax: 0.10.0
libtpu: 0.0.40
codegen_flags: <defaults>
</compile_context>

<pallas_src>
import jax
import jax.numpy as jnp
from jax import lax
from jax.experimental import pallas as pl
from jax.experimental.pallas import tpu as pltpu


# --------------------------------------------------------------------------
# Kernels
# --------------------------------------------------------------------------

def _xw1_kernel(x_ref, w1_ref, s1_ref):
    # support1 row-tile = x_tile @ W1   (bf16 operands, f32 accumulation)
    s1_ref[...] = jnp.dot(
        x_ref[...].astype(jnp.bfloat16),
        w1_ref[...].astype(jnp.bfloat16),
        preferred_element_type=jnp.float32)


def _gc1_kernel(adj_ref, s1_ref, b1_ref, w2_ref, alpha_ref, s2_ref):
    # h_i  = PReLU(adj_i @ support1 + b1)
    # s2_i = h_i @ W2      (support2 row-tile; W2 applied row-wise)
    h = jnp.dot(adj_ref[...], s1_ref[...].astype(jnp.bfloat16),
                preferred_element_type=jnp.float32) + b1_ref[...]
    alpha = alpha_ref[0, 0]                      # SMEM scalar
    h = jnp.where(h > 0.0, h, alpha * h)
    s2_ref[...] = jnp.dot(h.astype(jnp.bfloat16),
                          w2_ref[...].astype(jnp.bfloat16),
                          preferred_element_type=jnp.float32)


def _gc2_kernel(adj_ref, s2_ref, b2_ref, z_ref):
    # z_i = adj_i @ support2 + b2
    z_ref[...] = jnp.dot(adj_ref[...], s2_ref[...].astype(jnp.bfloat16),
                         preferred_element_type=jnp.float32) + b2_ref[...]


def _decoder_kernel(zi_ref, zj_ref, out_ref):
    # adj_hat[i, j] = z_i @ z_j.T  -- contract last dims, no explicit transpose
    out_ref[...] = lax.dot_general(
        zi_ref[...].astype(jnp.bfloat16),
        zj_ref[...].astype(jnp.bfloat16),
        dimension_numbers=(((1,), (1,)), ((), ())),
        preferred_element_type=jnp.float32)


# --------------------------------------------------------------------------
# Wrapper
# --------------------------------------------------------------------------

def _pick_tile(n, candidates):
    """Largest candidate dividing n, else full dim (always a legal block)."""
    for c in candidates:
        if n % c == 0:
            return c
    return n


def gae_forward(x, adj, w1, b1, w2, b2, alpha):
    N, D = x.shape
    H = w1.shape[1]
    L = w2.shape[1]
    f32 = jnp.float32

    # bf16 operands for every MXU matmul (f32 accumulation inside kernels):
    # halves the dominant HBM read (adj) and doubles MXU throughput.
    adj_bf16 = adj.astype(jnp.bfloat16)
    x = x.astype(f32)

    tm = _pick_tile(N, (256, 128))        # encoder adj row tile
    tmd = _pick_tile(N, (256, 128))       # decoder output row tile
    tnd = _pick_tile(N, (512, 256, 128))  # decoder output col tile (lane-dense)

    par1 = pltpu.CompilerParams(dimension_semantics=("parallel",))
    par2 = pltpu.CompilerParams(dimension_semantics=("parallel", "parallel"))

    # ---- stage 0: support1 = x @ W1  (row-tiled over nodes) ------------------
    s1 = pl.pallas_call(
        _xw1_kernel,
        out_shape=jax.ShapeDtypeStruct((N, H), f32),
        grid=(N // tm,),
        in_specs=[pl.BlockSpec((tm, D), lambda i: (i, 0)),
                  pl.BlockSpec((D, H), lambda i: (0, 0))],
        out_specs=pl.BlockSpec((tm, H), lambda i: (i, 0)),
        compiler_params=par1,
        cost_estimate=pl.CostEstimate(
            flops=2 * N * D * H, transcendentals=0,
            bytes_accessed=4 * (N * D + D * H + N * H)),
    )(x, w1)

    # ---- stage 1: support2 = PReLU(adj @ support1 + b1) @ W2 -----------------
    # (adj row-tiled; support1 / W2 / b1 fully resident; alpha in SMEM)
    s2 = pl.pallas_call(
        _gc1_kernel,
        out_shape=jax.ShapeDtypeStruct((N, L), f32),
        grid=(N // tm,),
        in_specs=[pl.BlockSpec((tm, N), lambda i: (i, 0)),
                  pl.BlockSpec((N, H), lambda i: (0, 0)),
                  pl.BlockSpec((1, H), lambda i: (0, 0)),
                  pl.BlockSpec((H, L), lambda i: (0, 0)),
                  pl.BlockSpec(memory_space=pltpu.MemorySpace.SMEM)],
        out_specs=pl.BlockSpec((tm, L), lambda i: (i, 0)),
        compiler_params=par1,
        cost_estimate=pl.CostEstimate(
            flops=2 * N * N * H + 2 * N * H * L, transcendentals=0,
            bytes_accessed=2 * N * N + 4 * (N * H + N * L)),
    )(adj_bf16, s1, b1, w2, alpha)

    # ---- stage 2: z = adj @ support2 + b2  (adj row-tiled) --------------------
    z = pl.pallas_call(
        _gc2_kernel,
        out_shape=jax.ShapeDtypeStruct((N, L), f32),
        grid=(N // tm,),
        in_specs=[pl.BlockSpec((tm, N), lambda i: (i, 0)),
                  pl.BlockSpec((N, L), lambda i: (0, 0)),
                  pl.BlockSpec((1, L), lambda i: (0, 0))],
        out_specs=pl.BlockSpec((tm, L), lambda i: (i, 0)),
        compiler_params=par1,
        cost_estimate=pl.CostEstimate(
            flops=2 * N * N * L, transcendentals=0,
            bytes_accessed=2 * N * N + 4 * (2 * N * L)),
    )(adj_bf16, s2, b2)

    # ---- stage 3 (decoder): adj_hat[i, j] = z_i @ z_j^T  (2-D output grid) ----
    adj_hat = pl.pallas_call(
        _decoder_kernel,
        out_shape=jax.ShapeDtypeStruct((N, N), f32),
        grid=(N // tmd, N // tnd),
        in_specs=[pl.BlockSpec((tmd, L), lambda i, j: (i, 0)),
                  pl.BlockSpec((tnd, L), lambda i, j: (j, 0))],
        out_specs=pl.BlockSpec((tmd, tnd), lambda i, j: (i, j)),
        compiler_params=par2,
        cost_estimate=pl.CostEstimate(
            flops=2 * N * N * L, transcendentals=0,
            bytes_accessed=4 * N * N + 2 * 4 * N * L),
    )(z, z)

    return adj_hat


# --------------------------------------------------------------------------
# Reference / init helpers
# --------------------------------------------------------------------------

def xavier_uniform(key, fan_in, fan_out, dtype=jnp.float32):
    limit = jnp.sqrt(6.0 / (fan_in + fan_out))
    return jax.random.uniform(key, (fan_in, fan_out), dtype, -limit, limit)


def reference_forward(x, adj, w1, b1, w2, b2, alpha):
    h = adj @ (x @ w1) + b1
    h = jnp.where(h > 0.0, h, alpha * h)
    z = adj @ (h @ w2) + b2
    return z @ z.T


if __name__ == "__main__":
    # Small, forward-consistent shapes: N nodes, D input features,
    # H hidden units, L latent units. N chosen so the grids have >1 step.
    N, D, H, L = 512, 64, 32, 16

    key = jax.random.PRNGKey(0)
    kx, kadj, kw1, kw2 = jax.random.split(key, 4)

    # deterministic synthetic "graph data"
    x = jax.random.normal(kx, (N, D), jnp.float32)
    # symmetric normalized-ish adjacency (dense stand-in for adj_norm)
    a_raw = (jax.random.uniform(kadj, (N, N)) < 0.05).astype(jnp.float32)
    a_sym = jnp.minimum(a_raw + a_raw.T, 1.0) + jnp.eye(N, dtype=jnp.float32)
    deg = a_sym.sum(axis=1, keepdims=True)
    d_inv_sqrt = 1.0 / jnp.sqrt(deg)
    adj = d_inv_sqrt * a_sym * d_inv_sqrt.T

    # deterministic parameter init (xavier_uniform, matching module __init__)
    w1 = xavier_uniform(kw1, D, H)
    b1 = jnp.zeros((1, H), jnp.float32)          # GraphConvolution bias init
    w2 = xavier_uniform(kw2, H, L)
    b2 = jnp.zeros((1, L), jnp.float32)
    alpha = jnp.full((1, 1), 0.25, jnp.float32)  # nn.PReLU default

    adj_hat = gae_forward(x, adj, w1, b1, w2, b2, alpha)
    jax.block_until_ready(adj_hat)

    ref = reference_forward(x, adj, w1, b1, w2, b2, alpha)
    assert adj_hat.shape == (N, N)
    assert bool(jnp.isfinite(adj_hat).all())
    # bf16 MXU operands with f32 accumulation: allow a few percent relative
    # (Frobenius) deviation from the pure-f32 reference.
    rel_err = float(jnp.linalg.norm(adj_hat - ref) / jnp.linalg.norm(ref))
    assert rel_err < 5e-2, f"relative error too large: {rel_err}"

    print("KERNEL_OK")
</pallas_src>

<mosaic_0001>
module attributes {stable_mosaic.version = 11 : i64} {
  func.func @_xw1_kernel(%arg0: i32, %arg1: memref<256x64xf32, #tpu.memory_space<vmem>>, %arg2: memref<64x32xf32, #tpu.memory_space<vmem>>, %arg3: memref<256x32xf32, #tpu.memory_space<vmem>>) attributes {dimension_semantics = [#tpu.dimension_semantics<parallel>], iteration_bounds = array<i64: 2>, scalar_prefetch = 0 : i64, scratch_operands = 0 : i64, tpu.core_type = #tpu.core_type<tc>, window_params = [{transform_indices = @transform_0, window_bounds = array<i64: 256, 64>}, {pipeline_mode = #tpu.pipeline_mode<synchronous>, transform_indices = @transform_1, window_bounds = array<i64: 64, 32>}, {transform_indices = @transform_2, window_bounds = array<i64: 256, 32>}]} {
    %c0 = arith.constant 0 : index
    %c0_0 = arith.constant 0 : index
    %0 = vector.load %arg1[%c0, %c0_0] : memref<256x64xf32, #tpu.memory_space<vmem>>, vector<256x64xf32>
    %1 = arith.truncf %0 : vector<256x64xf32> to vector<256x64xbf16>
    %c0_1 = arith.constant 0 : index
    %c0_2 = arith.constant 0 : index
    %2 = vector.load %arg2[%c0_1, %c0_2] : memref<64x32xf32, #tpu.memory_space<vmem>>, vector<64x32xf32>
    %3 = arith.truncf %2 : vector<64x32xf32> to vector<64x32xbf16>
    %cst = arith.constant dense<0.000000e+00> : vector<256x32xf32>
    %4 = tpu.matmul %1, %3, %cst {dimension_numbers = #tpu.dot_dimension_numbers<[1], [0], [0], [1], [0, 0, 1, 1], [], []>} : vector<256x64xbf16>, vector<64x32xbf16>, vector<256x32xf32> -> vector<256x32xf32>
    %c0_3 = arith.constant 0 : index
    %c0_4 = arith.constant 0 : index
    %5 = vector.load %arg3[%c0_3, %c0_4] : memref<256x32xf32, #tpu.memory_space<vmem>>, vector<256x32xf32>
    tpu.vector_store %arg3[%c0_3, %c0_4], %4 {strides = array<i32>} : memref<256x32xf32, #tpu.memory_space<vmem>>, vector<256x32xf32>,
    return
  }
  func.func @transform_0(%arg0: i32) -> (i32, i32) {
    %c0_i32 = arith.constant 0 : i32
    %c0_i32_0 = arith.constant 0 : i32
    return %arg0, %c0_i32 : i32, i32
  }
  func.func @transform_1(%arg0: i32) -> (i32, i32) {
    %c0_i32 = arith.constant 0 : i32
    %c0_i32_0 = arith.constant 0 : i32
    %c0_i32_1 = arith.constant 0 : i32
    return %c0_i32, %c0_i32_0 : i32, i32
  }
  func.func @transform_2(%arg0: i32) -> (i32, i32) {
    %c0_i32 = arith.constant 0 : i32
    %c0_i32_0 = arith.constant 0 : i32
    return %arg0, %c0_i32 : i32, i32
  }
}

</mosaic_0001>

<bundles_post_ra>
// kernel: tpu_custom_call.1
= control target key start
LH: loop header
LB: loop body
LE: loop exit
PB: predicated region body
PF: predicated region fallthrough
CT: control target
= control target key end

     0   :  { %s633_s9 = smov 0   ;;  %s797_s0 = inlined_call_operand.vmem [shape: f32[512,64], index: 0, kind: input, shape index: {}]   ;;  %s798_s1 = inlined_call_operand.vmem [shape: f32[64,32], index: 1, kind: input, shape index: {}]   ;;  %s799_s2 = inlined_call_operand.vmem [shape: f32[512,32], index: 2, kind: output, shape index: {}]  }
   0x1 LB: > { %s507_s10 = sadd.s32 4294967295, %s616_s9   ;;  %p511_p0 = scmp.ge.s32.totalorder %s616_s9, 1  ;;  %s616_s9 = sphi %s633_s9, %s12_s9  }
   0x2   : > { %p113_p1 = scmp.lt.s32.totalorder %s616_s9, 3 }
   0x4   : > { %p114_p2 = pnand %p511_p0, %p113_p1 }
   0x5   : > { %v196_v0 = vld [vmem:[%s798_s1] sm:$0xff] (!%p114_p2)  ;;  %v197_v1 = vld [vmem:[%s798_s1 + $0x8] sm:$0xff] (!%p114_p2)  ;;  %v198_v2 = vld [vmem:[%s798_s1 + $0x10] sm:$0xff] (!%p114_p2)  ;;  %s512_s17 = sshll.u32 (!%p114_p2), %s507_s10, 5  ;;  %vm208_vm0 = vcmask (!%p114_p2), 523264   ;;  %vm418_vm1 = vcmask (!%p114_p2), 261120  }
   0x6   : > { %117 = sbr.rel (%p114_p2) target bundleno = 264 (0x108), region = 28  ;;  %v204_v3 = vpack.c.bf16 (!%p114_p2), %v197_v1, %v196_v0  ;;  %v199_v4 = vld [vmem:[%s798_s1 + $0x18] sm:$0xff] (!%p114_p2)  ;;  %p136_p3 = scmp.lt.s32.totalorder (!%p114_p2), %s512_s17, 63  ;;  %v200_v6 = vld [vmem:[%s798_s1 + $0x20] sm:$0xff] (!%p114_p2)  ;;  %v201_v7 = vld [vmem:[%s798_s1 + $0x28] sm:$0xff] (!%p114_p2) }
   0x7   : > { %v205_v5 = vpack.c.bf16 (!%p114_p2), %v199_v4, %v198_v2  ;;  %v206_v8 = vpack.c.bf16 (!%p114_p2), %v201_v7, %v200_v6  ;;  %v202_v9 = vld [vmem:[%s798_s1 + $0x30] sm:$0xff] (!%p114_p2)  ;;  %v203_v10 = vld [vmem:[%s798_s1 + $0x38] sm:$0xff] (!%p114_p2) }
   0x8   : > { %554 = vmatprep.subr.bf16.mxu0 (!%p114_p2), %v204_v3  ;;  %594 = vmatprep.subr.bf16.mxu1 (!%p114_p2), %v204_v3  ;;  %v207_v16 = vpack.c.bf16 (!%p114_p2), %v203_v10, %v202_v9 }
   0x9   : > { %555 = vmatpush3.bf16.msra.mxu0 (!%p114_p2), %v204_v3  ;;  %598 = vmatpush3.bf16.msra.mxu1 (!%p114_p2), %v204_v3 }
   0xa   : > { %556 = vmatprep.subr.bf16.mxu0 (!%p114_p2), %v205_v5  ;;  %595 = vmatprep.subr.bf16.mxu1 (!%p114_p2), %v205_v5 }
   0xd   : > { %s801_s17 = smov (!%p136_p3, %s512_s17), 63  ;;  %557 = vmatpush3.bf16.msra.mxu0 %v205_v5  ;;  %599 = vmatpush3.bf16.msra.mxu1 %v205_v5 }
   0xe   : > { %s513_s24 = sshll.u32 %s801_s17, 3  ;;  %558 = vmatprep.subr.bf16.mxu0 %v206_v8  ;;  %596 = vmatprep.subr.bf16.mxu1 %v206_v8 }
   0xf   : > { %s673_s3 = scalar_lea.vmem %s797_s0, %s513_s24  ;;  %s728_s6 = scalar_lea.vmem %s799_s2, %s513_s24 }
  0x10   : > { %v148_v11 = vld [vmem:[%s673_s3] sm:$0xff]  ;;  %v149_v12 = vld [vmem:[%s673_s3 + $0x8] sm:$0xff]  ;;  %v150_v18 = vld [vmem:[%s673_s3 + $0x10] sm:$0xff] }
  0x11   : > { %v164_v13 = vld [vmem:[%s673_s3 + $0x80] sm:$0xff]  ;;  %v180_v14 = vpack.c.bf16 %v149_v12, %v148_v11  ;;  %v165_v15 = vld [vmem:[%s673_s3 + $0x88] sm:$0xff]  ;;  %v151_v19 = vld [vmem:[%s673_s3 + $0x18] sm:$0xff]  ;;  %559 = vmatpush3.bf16.msra.mxu0 %v206_v8  ;;  %600 = vmatpush3.bf16.msra.mxu1 %v206_v8 }
  0x12   : > { %v188_v17 = vpack.c.bf16 %v165_v15, %v164_v13  ;;  %v166_v20 = vld [vmem:[%s673_s3 + $0x90] sm:$0xff]  ;;  %v167_v21 = vld [vmem:[%s673_s3 + $0x98] sm:$0xff]  ;;  %v152_v22 = vld [vmem:[%s673_s3 + $0x20] sm:$0xff]  ;;  %560 = vmatprep.subr.bf16.mxu0 %v207_v16  ;;  %597 = vmatprep.subr.bf16.mxu1 %v207_v16  ;;  %v181_v26 = vpack.c.bf16 %v151_v19, %v150_v18 }
  0x13   : > { %562 = vmatprep.mubr.msk.bf16.mxu0 %vm208_vm0, %v180_v14  ;;  %v153_v23 = vld [vmem:[%s673_s3 + $0x28] sm:$0xff]  ;;  %v168_v24 = vld [vmem:[%s673_s3 + $0xa0] sm:$0xff]  ;;  %v189_v27 = vpack.c.bf16 %v167_v21, %v166_v20  ;;  %v154_v30 = vld [vmem:[%s673_s3 + $0x30] sm:$0xff] }
  0x14   : > { %578 = vmatprep.mubr.msk.bf16.mxu1 %vm208_vm0, %v188_v17  ;;  %v169_v25 = vld [vmem:[%s673_s3 + $0xa8] sm:$0xff]  ;;  %v182_v28 = vpack.c.bf16 %v153_v23, %v152_v22  ;;  %v155_v31 = vld [vmem:[%s673_s3 + $0x38] sm:$0xff]  ;;  %v170_v32 = vld [vmem:[%s673_s3 + $0xb0] sm:$0xff] }
  0x15   : > { %561 = vmatpush3.bf16.msra.mxu0 %v207_v16  ;;  %601 = vmatpush3.bf16.msra.mxu1 %v207_v16  ;;  %v190_v29 = vpack.c.bf16 %v169_v25, %v168_v24  ;;  %v171_v33 = vld [vmem:[%s673_s3 + $0xb8] sm:$0xff]  ;;  %v156_v34 = vld [vmem:[%s673_s3 + $0x40] sm:$0xff]  ;;  %v157_v35 = vld [vmem:[%s673_s3 + $0x48] sm:$0xff]  ;;  %v183_v38 = vpack.c.bf16 %v155_v31, %v154_v30 }
  0x16   : > { %v172_v36 = vld [vmem:[%s673_s3 + $0xc0] sm:$0xff]  ;;  %v173_v37 = vld [vmem:[%s673_s3 + $0xc8] sm:$0xff]  ;;  %v191_v39 = vpack.c.bf16 %v171_v33, %v170_v32  ;;  %v184_v40 = vpack.c.bf16 %v157_v35, %v156_v34  ;;  %v158_v42 = vld [vmem:[%s673_s3 + $0x50] sm:$0xff] }
  0x17   : > { %v192_v41 = vpack.c.bf16 %v173_v37, %v172_v36  ;;  %v159_v43 = vld [vmem:[%s673_s3 + $0x58] sm:$0xff]  ;;  %v174_v44 = vld [vmem:[%s673_s3 + $0xd0] sm:$0xff]  ;;  %v160_v46 = vld [vmem:[%s673_s3 + $0x60] sm:$0xff] }
  0x18   : > { %563 = vmatmul.mubr.msk.bf16.vlgmr.msra.gmra.mrb[0].mxu0 %vm208_vm0, %v181_v26  ;;  %579 = vmatmul.mubr.msk.bf16.vlgmr.msra.gmra.mrb[0].mxu1 %vm208_vm0, %v189_v27  ;;  %v175_v45 = vld [vmem:[%s673_s3 + $0xd8] sm:$0xff]  ;;  %v161_v47 = vld [vmem:[%s673_s3 + $0x68] sm:$0xff]  ;;  %v176_v48 = vld [vmem:[%s673_s3 + $0xe0] sm:$0xff]  ;;  %v185_v50 = vpack.c.bf16 %v159_v43, %v158_v42 }
  0x19   : > { %566 = vmatprep.mubr.msk.bf16.mxu0 %vm208_vm0, %v182_v28  ;;  %582 = vmatprep.mubr.msk.bf16.mxu1 %vm208_vm0, %v190_v29  ;;  %v177_v49 = vld [vmem:[%s673_s3 + $0xe8] sm:$0xff]  ;;  %v193_v51 = vpack.c.bf16 %v175_v45, %v174_v44  ;;  %v186_v52 = vpack.c.bf16 %v161_v47, %v160_v46  ;;  %v162_v54 = vld [vmem:[%s673_s3 + $0x70] sm:$0xff]  ;;  %v163_v55 = vld [vmem:[%s673_s3 + $0x78] sm:$0xff] }
  0x1a   : > { %v194_v53 = vpack.c.bf16 %v177_v49, %v176_v48  ;;  %v178_v56 = vld [vmem:[%s673_s3 + $0xf0] sm:$0xff]  ;;  %v179_v57 = vld [vmem:[%s673_s3 + $0xf8] sm:$0xff]  ;;  %v187_v58 = vpack.c.bf16 %v163_v55, %v162_v54 }
  0x1b   : > { %v195_v59 = vpack.c.bf16 %v179_v57, %v178_v56 }
  0x20   : > { %567 = vmatmul.mubr.msk.bf16.gmra.mrb[4].mxu0 %vm208_vm0, %v183_v38  ;;  %583 = vmatmul.mubr.msk.bf16.gmra.mrb[4].mxu1 %vm208_vm0, %v191_v39 }
  0x21   : > { %570 = vmatprep.mubr.msk.bf16.mxu0 %vm208_vm0, %v184_v40  ;;  %586 = vmatprep.mubr.msk.bf16.mxu1 %vm208_vm0, %v192_v41 }
  0x28   : > { %571 = vmatmul.mubr.msk.bf16.gmra.mrb[8].mxu0 %vm208_vm0, %v185_v50  ;;  %587 = vmatmul.mubr.msk.bf16.gmra.mrb[8].mxu1 %vm208_vm0, %v193_v51 }
  0x29   : > { %574 = vmatprep.mubr.msk.bf16.mxu0 %vm208_vm0, %v186_v52  ;;  %590 = vmatprep.mubr.msk.bf16.mxu1 %vm208_vm0, %v194_v53 }
  0x30   : > { %575 = vmatmul.mubr.msk.bf16.gmra.mrb[12].mxu0 %vm208_vm0, %v187_v58  ;;  %591 = vmatmul.mubr.msk.bf16.gmra.mrb[12].mxu1 %vm208_vm0, %v195_v59 }
  0xeb   : > { %v564_v60 = vpop.f32.mrb[0].mxu0  ;;  %v580_v61 = vpop.f32.mrb[0].mxu1 }
  0xec   : > { %421 = vst.msk [vmem:[%s728_s6 + $0x10] sm:$0xff] %vm418_vm1, %v564_v60  ;;  %437 = vst.msk [vmem:[%s728_s6 + $0x90] sm:$0xff] %vm418_vm1, %v580_v61  ;;  %v291_v62 = vpop.f32.mrb[1].mxu0  ;;  %v355_v63 = vpop.f32.mrb[1].mxu1 }
  0xed   : > { %419 = vst.msk [vmem:[%s728_s6] sm:$0xff] %vm418_vm1, %v291_v62  ;;  %435 = vst.msk [vmem:[%s728_s6 + $0x80] sm:$0xff] %vm418_vm1, %v355_v63  ;;  %v565_v0 = vpop.f32.mrb[2].mxu0  ;;  %v581_v1 = vpop.f32.mrb[2].mxu1 }
  0xee   : > { %422 = vst.msk [vmem:[%s728_s6 + $0x18] sm:$0xff] %vm418_vm1, %v565_v0  ;;  %438 = vst.msk [vmem:[%s728_s6 + $0x98] sm:$0xff] %vm418_vm1, %v581_v1  ;;  %v294_v2 = vpop.f32.mrb[3].mxu0  ;;  %v358_v3 = vpop.f32.mrb[3].mxu1 }
  0xef   : > { %420 = vst.msk [vmem:[%s728_s6 + $0x8] sm:$0xff] %vm418_vm1, %v294_v2  ;;  %436 = vst.msk [vmem:[%s728_s6 + $0x88] sm:$0xff] %vm418_vm1, %v358_v3 }
  0xf3   : > { %v568_v4 = vpop.f32.mrb[4].mxu0  ;;  %v584_v5 = vpop.f32.mrb[4].mxu1 }
  0xf4   : > { %425 = vst.msk [vmem:[%s728_s6 + $0x30] sm:$0xff] %vm418_vm1, %v568_v4  ;;  %441 = vst.msk [vmem:[%s728_s6 + $0xb0] sm:$0xff] %vm418_vm1, %v584_v5  ;;  %v307_v6 = vpop.f32.mrb[5].mxu0  ;;  %v371_v7 = vpop.f32.mrb[5].mxu1 }
  0xf5   : > { %423 = vst.msk [vmem:[%s728_s6 + $0x20] sm:$0xff] %vm418_vm1, %v307_v6  ;;  %439 = vst.msk [vmem:[%s728_s6 + $0xa0] sm:$0xff] %vm418_vm1, %v371_v7  ;;  %v569_v8 = vpop.f32.mrb[6].mxu0  ;;  %v585_v9 = vpop.f32.mrb[6].mxu1 }
  0xf6   : > { %426 = vst.msk [vmem:[%s728_s6 + $0x38] sm:$0xff] %vm418_vm1, %v569_v8  ;;  %442 = vst.msk [vmem:[%s728_s6 + $0xb8] sm:$0xff] %vm418_vm1, %v585_v9  ;;  %v310_v10 = vpop.f32.mrb[7].mxu0  ;;  %v374_v11 = vpop.f32.mrb[7].mxu1 }
  0xf7   : > { %424 = vst.msk [vmem:[%s728_s6 + $0x28] sm:$0xff] %vm418_vm1, %v310_v10  ;;  %440 = vst.msk [vmem:[%s728_s6 + $0xa8] sm:$0xff] %vm418_vm1, %v374_v11 }
  0xfb   : > { %v572_v12 = vpop.f32.mrb[8].mxu0  ;;  %v588_v13 = vpop.f32.mrb[8].mxu1 }
  0xfc   : > { %429 = vst.msk [vmem:[%s728_s6 + $0x50] sm:$0xff] %vm418_vm1, %v572_v12  ;;  %445 = vst.msk [vmem:[%s728_s6 + $0xd0] sm:$0xff] %vm418_vm1, %v588_v13  ;;  %v323_v14 = vpop.f32.mrb[9].mxu0  ;;  %v387_v15 = vpop.f32.mrb[9].mxu1 }
  0xfd   : > { %427 = vst.msk [vmem:[%s728_s6 + $0x40] sm:$0xff] %vm418_vm1, %v323_v14  ;;  %443 = vst.msk [vmem:[%s728_s6 + $0xc0] sm:$0xff] %vm418_vm1, %v387_v15  ;;  %v573_v16 = vpop.f32.mrb[10].mxu0  ;;  %v589_v17 = vpop.f32.mrb[10].mxu1 }
  0xfe   : > { %430 = vst.msk [vmem:[%s728_s6 + $0x58] sm:$0xff] %vm418_vm1, %v573_v16  ;;  %446 = vst.msk [vmem:[%s728_s6 + $0xd8] sm:$0xff] %vm418_vm1, %v589_v17  ;;  %v326_v18 = vpop.f32.mrb[11].mxu0  ;;  %v390_v19 = vpop.f32.mrb[11].mxu1 }
  0xff   : > { %428 = vst.msk [vmem:[%s728_s6 + $0x48] sm:$0xff] %vm418_vm1, %v326_v18  ;;  %444 = vst.msk [vmem:[%s728_s6 + $0xc8] sm:$0xff] %vm418_vm1, %v390_v19 }
 0x103   : > { %v576_v20 = vpop.f32.mrb[12].mxu0  ;;  %v592_v21 = vpop.f32.mrb[12].mxu1 }
 0x104   : > { %433 = vst.msk [vmem:[%s728_s6 + $0x70] sm:$0xff] %vm418_vm1, %v576_v20  ;;  %449 = vst.msk [vmem:[%s728_s6 + $0xf0] sm:$0xff] %vm418_vm1, %v592_v21  ;;  %v339_v22 = vpop.f32.mrb[13].mxu0  ;;  %v403_v23 = vpop.f32.mrb[13].mxu1 }
 0x105   : > { %431 = vst.msk [vmem:[%s728_s6 + $0x60] sm:$0xff] %vm418_vm1, %v339_v22  ;;  %447 = vst.msk [vmem:[%s728_s6 + $0xe0] sm:$0xff] %vm418_vm1, %v403_v23  ;;  %v577_v24 = vpop.f32.mrb[14].mxu0  ;;  %v593_v25 = vpop.f32.mrb[14].mxu1 }
 0x106   : > { %434 = vst.msk [vmem:[%s728_s6 + $0x78] sm:$0xff] %vm418_vm1, %v577_v24  ;;  %450 = vst.msk [vmem:[%s728_s6 + $0xf8] sm:$0xff] %vm418_vm1, %v593_v25  ;;  %v342_v26 = vpop.f32.mrb[15].mxu0  ;;  %v406_v27 = vpop.f32.mrb[15].mxu1 }
 0x107   : > { %432 = vst.msk [vmem:[%s728_s6 + $0x68] sm:$0xff] %vm418_vm1, %v342_v26  ;;  %448 = vst.msk [vmem:[%s728_s6 + $0xe8] sm:$0xff] %vm418_vm1, %v406_v27 }
 0x108 PF: > { %s12_s9 = sadd.s32 1, %s616_s9  }
 0x109   : > { %p9_p4 = scmp.ge.s32.totalorder %s12_s9, 4  }
 0x10b   :  { %11 = sbr.rel (!%p9_p4) target bundleno = 1 (0x1), region = 58 }

</bundles_post_ra>
